<compile_context>
chip_gen: v7x
topology: tpu7x:2x2x1
jax: 0.10.0
libtpu: 0.0.40
codegen_flags: <defaults>
</compile_context>

<pallas_src>
import jax
import jax.numpy as jnp
from jax.experimental import pallas as pl
from jax.experimental.pallas import tpu as pltpu


def _round_up(x, m):
    return ((x + m - 1) // m) * m


def _cdiv(a, b):
    return -(-a // b)


def _vmem_budget_bytes():
    """~75% of physical VMEM, capped at 100 MiB (safe across v5e/v6e/v7x)."""
    cap = 64 * 1024 * 1024  # conservative default (v7x per-TC VMEM)
    try:
        info = pltpu.get_tpu_info()
        c = getattr(info, "vmem_capacity_bytes", None)
        if c:
            cap = int(c)
    except Exception:
        pass
    return min(cap * 3 // 4, 100 * 1024 * 1024)


# --------------------------------------------------------------------------
# Kernels
# --------------------------------------------------------------------------
def _svd_lowrank_kernel(x_ref, v_ref, u_ref, b_ref, o_ref, t_ref):
    # t = x_tile @ (V*S): computed once per batch tile (j == 0) and cached in
    # VMEM scratch; the j axis is "arbitrary" so the scratch persists.
    @pl.when(pl.program_id(1) == 0)
    def _():
        t = jnp.dot(x_ref[...], v_ref[...], preferred_element_type=jnp.float32)
        t_ref[...] = t.astype(t_ref.dtype)

    # [TM, r] @ [r, TN] -> [TM, TN], f32 accumulation, bias add, store.
    out = jnp.dot(t_ref[...], u_ref[...], preferred_element_type=jnp.float32)
    o_ref[...] = (out + b_ref[...]).astype(o_ref.dtype)


def _dense_kernel(x_ref, w_ref, b_ref, o_ref, acc_ref):
    # Standard K-tiled matmul with f32 accumulator; used when the low-rank
    # factorization does not save work (rank close to min(in, out)) or when
    # a (TM, in_features) block cannot fit VMEM.
    k = pl.program_id(2)

    @pl.when(k == 0)
    def _():
        acc_ref[...] = jnp.zeros_like(acc_ref)

    acc_ref[...] += jnp.dot(x_ref[...], w_ref[...],
                            preferred_element_type=jnp.float32)

    @pl.when(k == pl.num_programs(2) - 1)
    def _():
        o_ref[...] = (acc_ref[...] + b_ref[...]).astype(o_ref.dtype)


# --------------------------------------------------------------------------
# Wrapper
# --------------------------------------------------------------------------
def svd_linear(x, U, S, V, bias=None, *, compute_dtype=jnp.bfloat16,
               tm_target=None, tn_target=None):
    """Pallas TPU implementation of SVDLinear.forward.

    compute_dtype: operand dtype for the matmuls (default bf16, MXU-native on
                   v5e/v6e/v7x). Accumulation is always f32; output keeps
                   x.dtype. Use jnp.float32 for reference-exact results.
    """
    B, in_f = x.shape
    out_f, rank = U.shape
    cdt = jnp.dtype(compute_dtype if compute_dtype is not None else x.dtype)
    out_dt = x.dtype
    csz = cdt.itemsize
    osz = jnp.dtype(out_dt).itemsize

    budget = _vmem_budget_bytes()
    if tm_target is None:
        tm_target = 512 if budget >= 90 * 1024 * 1024 else 256
    if tn_target is None:
        tn_target = 1024 if budget >= 90 * 1024 * 1024 else 512

    # Sublane alignment of the batch tile: 8 for 4-byte, 16 for bf16, 32 for 8-bit.
    row_align = {4: 8, 2: 16, 1: 32}.get(csz, 8)

    b = bias if bias is not None else jnp.zeros((out_f,), jnp.float32)

    # Low-rank path only pays off when rank*(in+out) << in*out.
    lowrank_ok = rank * (in_f + out_f) < in_f * out_f

    if lowrank_ok:
        TM = min(tm_target, _round_up(B, row_align))
        TN = min(tn_target, _round_up(out_f, 128))

        # Keep >= 2 batch tiles when B allows, so both v7x TensorCores get
        # work (the j axis is sequential for the t-cache).
        if _cdiv(_round_up(B, row_align), TM) < 2:
            tm_half = _round_up(_cdiv(B, 2), row_align)
            if row_align <= tm_half < _round_up(B, row_align):
                TM = tm_half

        def footprint(tm, tn):
            return (2 * tm * in_f * csz              # x tile (double-buffered)
                    + 2 * in_f * rank * csz          # Vs (constant index; conservative 2x)
                    + 2 * rank * tn * csz            # U^T tile
                    + 2 * 8 * tn * 4                 # bias tile (sublane padded)
                    + 2 * tm * tn * osz              # output tile
                    + tm * max(rank, 128) * csz)     # t scratch (lane padded)

        while footprint(TM, TN) > budget and TM > row_align:
            TM = max(row_align, _round_up(TM // 2, row_align))
        while footprint(TM, TN) > budget and TN > 128:
            TN = max(128, _round_up(TN // 2, 128))
        if footprint(TM, TN) > budget:
            # (TM, in_features) block can't fit even at minimal tiles (huge
            # in_features): use the K-tiled dense fallback below instead of a
            # K-split of the low-rank path.
            lowrank_ok = False

    if lowrank_ok:
        # Host-side weight prep: fold S into V; pre-transpose U (lane-major).
        Vs = (V * S[None, :]).astype(cdt)    # [in_f, rank]
        Ut = U.T.astype(cdt)                 # [rank, out_f]

        Bp = _round_up(B, TM)
        Np = _round_up(out_f, TN)

        xp = x.astype(cdt)
        if Bp != B:
            xp = jnp.pad(xp, ((0, Bp - B), (0, 0)))
        Utp = Ut if Np == out_f else jnp.pad(Ut, ((0, 0), (0, Np - out_f)))
        bp = b if Np == out_f else jnp.pad(b, ((0, Np - out_f),))
        b2 = bp.reshape(1, Np).astype(jnp.float32)

        n_i, n_j = Bp // TM, Np // TN
        flops = 2 * Bp * in_f * rank + 2 * Bp * rank * Np + Bp * Np
        bytes_accessed = (Bp * in_f * csz          # x: fetched once per i tile
                          + in_f * rank * csz      # Vs: resident (constant index)
                          + n_i * rank * Np * csz  # U^T: re-fetched per i tile
                          + n_i * Np * 4           # bias: re-fetched per i tile
                          + Bp * Np * osz)         # output

        out = pl.pallas_call(
            _svd_lowrank_kernel,
            out_shape=jax.ShapeDtypeStruct((Bp, Np), out_dt),
            grid_spec=pltpu.PrefetchScalarGridSpec(
                num_scalar_prefetch=0,
                grid=(n_i, n_j),
                in_specs=[
                    pl.BlockSpec((TM, in_f), lambda i, j: (i, 0)),    # x tile
                    pl.BlockSpec((in_f, rank), lambda i, j: (0, 0)),  # Vs (resident)
                    pl.BlockSpec((rank, TN), lambda i, j: (0, j)),    # U^T tile
                    pl.BlockSpec((1, TN), lambda i, j: (0, j)),       # bias tile
                ],
                out_specs=pl.BlockSpec((TM, TN), lambda i, j: (i, j)),
                scratch_shapes=[pltpu.VMEM((TM, rank), cdt)],         # t cache
            ),
            compiler_params=pltpu.CompilerParams(
                dimension_semantics=("parallel", "arbitrary"),
                vmem_limit_bytes=budget,
            ),
            cost_estimate=pl.CostEstimate(flops=flops, transcendentals=0,
                                          bytes_accessed=bytes_accessed),
        )(xp, Vs, Utp, b2)
        return out[:B, :out_f]

    # ---------------- Dense fallback: W = (V*S) @ U.T ----------------------
    W = ((V * S[None, :]) @ U.T).astype(cdt)     # [in_f, out_f], f32 fold
    TM = min(256, _round_up(B, row_align))
    if _cdiv(_round_up(B, row_align), TM) < 2:
        tm_half = _round_up(_cdiv(B, 2), row_align)
        if row_align <= tm_half < _round_up(B, row_align):
            TM = tm_half
    TN = min(512, _round_up(out_f, 128))
    TK = min(512, _round_up(in_f, 128))
    Bp = _round_up(B, TM)
    Np = _round_up(out_f, TN)
    Kp = _round_up(in_f, TK)

    xp = jnp.pad(x.astype(cdt), ((0, Bp - B), (0, Kp - in_f)))
    Wp = jnp.pad(W, ((0, Kp - in_f), (0, Np - out_f)))
    b2 = jnp.pad(b, ((0, Np - out_f),)).reshape(1, Np).astype(jnp.float32)

    n_i, n_j, n_k = Bp // TM, Np // TN, Kp // TK
    flops = 2 * Bp * Kp * Np + Bp * Np
    bytes_accessed = (n_j * Bp * Kp * csz + n_i * Kp * Np * csz
                      + n_i * Np * 4 + Bp * Np * osz)

    out = pl.pallas_call(
        _dense_kernel,
        out_shape=jax.ShapeDtypeStruct((Bp, Np), out_dt),
        grid_spec=pltpu.PrefetchScalarGridSpec(
            num_scalar_prefetch=0,
            grid=(n_i, n_j, n_k),
            in_specs=[
                pl.BlockSpec((TM, TK), lambda i, j, k: (i, k)),
                pl.BlockSpec((TK, TN), lambda i, j, k: (k, j)),
                pl.BlockSpec((1, TN), lambda i, j, k: (0, j)),
            ],
            out_specs=pl.BlockSpec((TM, TN), lambda i, j, k: (i, j)),
            scratch_shapes=[pltpu.VMEM((TM, TN), jnp.float32)],
        ),
        compiler_params=pltpu.CompilerParams(
            dimension_semantics=("parallel", "parallel", "arbitrary"),
            vmem_limit_bytes=budget,
        ),
        cost_estimate=pl.CostEstimate(flops=flops, transcendentals=0,
                                      bytes_accessed=bytes_accessed),
    )(xp, Wp, b2)
    return out[:B, :out_f]


if __name__ == "__main__":
    # Small deterministic shapes consistent with the module.
    B, in_features, rank, out_features = 8, 32, 16, 64

    key = jax.random.PRNGKey(0)
    kx, ku, ks, kv, kb = jax.random.split(key, 5)

    x = jax.random.normal(kx, (B, in_features), dtype=jnp.float32)
    U = jax.random.normal(ku, (out_features, rank), dtype=jnp.float32)
    S = jax.random.uniform(ks, (rank,), dtype=jnp.float32) + 0.5
    V = jax.random.normal(kv, (in_features, rank), dtype=jnp.float32)
    bias = jax.random.normal(kb, (out_features,), dtype=jnp.float32)

    # Reference (same math as the PyTorch forward).
    y_ref = ((x @ V) * S[None, :]) @ U.T + bias

    # Low-rank path, f32 operands: tight tolerance.
    y = jax.block_until_ready(
        svd_linear(x, U, S, V, bias, compute_dtype=jnp.float32))
    assert y.shape == (B, out_features)
    assert jnp.allclose(y, y_ref, atol=1e-4, rtol=1e-4)

    # Low-rank path, default bf16 operands (f32 MXU accumulation).
    y_bf16 = jax.block_until_ready(svd_linear(x, U, S, V, bias))
    assert y_bf16.shape == (B, out_features)
    assert jnp.allclose(y_bf16.astype(jnp.float32), y_ref, atol=1.0, rtol=5e-2)

    # Dense-fallback path (rank not meaningfully smaller than min(in, out)).
    rank_d = 32
    U2 = jax.random.normal(ku, (out_features, rank_d), dtype=jnp.float32)
    S2 = jax.random.uniform(ks, (rank_d,), dtype=jnp.float32) + 0.5
    V2 = jax.random.normal(kv, (in_features, rank_d), dtype=jnp.float32)
    y2_ref = ((x @ V2) * S2[None, :]) @ U2.T + bias
    y2 = jax.block_until_ready(
        svd_linear(x, U2, S2, V2, bias, compute_dtype=jnp.float32))
    assert y2.shape == (B, out_features)
    assert jnp.allclose(y2, y2_ref, atol=1e-3, rtol=1e-3)

    print("KERNEL_OK")
</pallas_src>

<mosaic_0001>
module attributes {stable_mosaic.version = 11 : i64} {
  func.func @_svd_lowrank_kernel(%arg0: i32, %arg1: i32, %arg2: memref<8x32xf32, #tpu.memory_space<vmem>>, %arg3: memref<32x16xf32, #tpu.memory_space<vmem>>, %arg4: memref<16x128xf32, #tpu.memory_space<vmem>>, %arg5: memref<1x128xf32, #tpu.memory_space<vmem>>, %arg6: memref<8x128xf32, #tpu.memory_space<vmem>>, %arg7: memref<8x16xf32, #tpu.memory_space<vmem>>) attributes {dimension_semantics = [#tpu.dimension_semantics<parallel>, #tpu.dimension_semantics<arbitrary>], iteration_bounds = array<i64: 1, 1>, scalar_prefetch = 0 : i64, scratch_operands = 1 : i64, tpu.core_type = #tpu.core_type<tc>, window_params = [{transform_indices = @transform_0, window_bounds = array<i64: 8, 32>}, {pipeline_mode = #tpu.pipeline_mode<synchronous>, transform_indices = @transform_1, window_bounds = array<i64: 32, 16>}, {transform_indices = @transform_2, window_bounds = array<i64: 16, 128>}, {transform_indices = @transform_3, window_bounds = array<i64: 1, 128>}, {transform_indices = @transform_4, window_bounds = array<i64: 8, 128>}]} {
    %c0_i32 = arith.constant 0 : i32
    %0 = arith.cmpi eq, %arg1, %c0_i32 : i32
    %1 = arith.extui %0 : i1 to i32
    %c0_i32_0 = arith.constant 0 : i32
    %2 = arith.cmpi ne, %1, %c0_i32_0 : i32
    scf.if %2 {
      %c0_8 = arith.constant 0 : index
      %c0_9 = arith.constant 0 : index
      %10 = vector.load %arg2[%c0_8, %c0_9] : memref<8x32xf32, #tpu.memory_space<vmem>>, vector<8x32xf32>
      %c0_10 = arith.constant 0 : index
      %c0_11 = arith.constant 0 : index
      %11 = vector.load %arg3[%c0_10, %c0_11] : memref<32x16xf32, #tpu.memory_space<vmem>>, vector<32x16xf32>
      %cst_12 = arith.constant dense<0.000000e+00> : vector<8x16xf32>
      %12 = tpu.matmul %10, %11, %cst_12 {dimension_numbers = #tpu.dot_dimension_numbers<[1], [0], [0], [1], [0, 0, 1, 1], [], []>} : vector<8x32xf32>, vector<32x16xf32>, vector<8x16xf32> -> vector<8x16xf32>
      %c0_13 = arith.constant 0 : index
      %c0_14 = arith.constant 0 : index
      %13 = vector.load %arg7[%c0_13, %c0_14] : memref<8x16xf32, #tpu.memory_space<vmem>>, vector<8x16xf32>
      tpu.vector_store %arg7[%c0_13, %c0_14], %12 {strides = array<i32>} : memref<8x16xf32, #tpu.memory_space<vmem>>, vector<8x16xf32>,
    } else {
    }
    %c0 = arith.constant 0 : index
    %c0_1 = arith.constant 0 : index
    %3 = vector.load %arg7[%c0, %c0_1] : memref<8x16xf32, #tpu.memory_space<vmem>>, vector<8x16xf32>
    %c0_2 = arith.constant 0 : index
    %c0_3 = arith.constant 0 : index
    %4 = vector.load %arg4[%c0_2, %c0_3] : memref<16x128xf32, #tpu.memory_space<vmem>>, vector<16x128xf32>
    %cst = arith.constant dense<0.000000e+00> : vector<8x128xf32>
    %5 = tpu.matmul %3, %4, %cst {dimension_numbers = #tpu.dot_dimension_numbers<[1], [0], [0], [1], [0, 0, 1, 1], [], []>} : vector<8x16xf32>, vector<16x128xf32>, vector<8x128xf32> -> vector<8x128xf32>
    %c0_4 = arith.constant 0 : index
    %c0_5 = arith.constant 0 : index
    %6 = vector.load %arg5[%c0_4, %c0_5] : memref<1x128xf32, #tpu.memory_space<vmem>>, vector<1x128xf32>
    %7 = vector.broadcast %6 : vector<1x128xf32> to vector<8x128xf32>
    %8 = arith.addf %5, %7 : vector<8x128xf32>
    %c0_6 = arith.constant 0 : index
    %c0_7 = arith.constant 0 : index
    %9 = vector.load %arg6[%c0_6, %c0_7] : memref<8x128xf32, #tpu.memory_space<vmem>>, vector<8x128xf32>
    tpu.vector_store %arg6[%c0_6, %c0_7], %8 {strides = array<i32>} : memref<8x128xf32, #tpu.memory_space<vmem>>, vector<8x128xf32>,
    return
  }
  func.func @transform_0(%arg0: i32, %arg1: i32) -> (i32, i32) {
    %c0_i32 = arith.constant 0 : i32
    %c0_i32_0 = arith.constant 0 : i32
    return %arg0, %c0_i32 : i32, i32
  }
  func.func @transform_1(%arg0: i32, %arg1: i32) -> (i32, i32) {
    %c0_i32 = arith.constant 0 : i32
    %c0_i32_0 = arith.constant 0 : i32
    %c0_i32_1 = arith.constant 0 : i32
    return %c0_i32, %c0_i32_0 : i32, i32
  }
  func.func @transform_2(%arg0: i32, %arg1: i32) -> (i32, i32) {
    %c0_i32 = arith.constant 0 : i32
    %c0_i32_0 = arith.constant 0 : i32
    return %c0_i32, %arg1 : i32, i32
  }
  func.func @transform_3(%arg0: i32, %arg1: i32) -> (i32, i32) {
    %c0_i32 = arith.constant 0 : i32
    %c0_i32_0 = arith.constant 0 : i32
    return %c0_i32, %arg1 : i32, i32
  }
  func.func @transform_4(%arg0: i32, %arg1: i32) -> (i32, i32) {
    %c0_i32 = arith.constant 0 : i32
    return %arg0, %arg1 : i32, i32
  }
}

</mosaic_0001>

<bundles_post_ra>
// kernel: tpu_custom_call.1
= control target key start
LH: loop header
LB: loop body
LE: loop exit
PB: predicated region body
PF: predicated region fallthrough
CT: control target
= control target key end

     0   :  { %v268_v3 = vmov 0.0|0.0   ;;  %vm269_vm0 = vmmov 0   ;;  %v270_v6 = vmov 0.0   ;;  %s333_s0 = inlined_call_operand.vmem [shape: f32[8,32], index: 0, kind: input, shape index: {}]   ;;  %s334_s1 = inlined_call_operand.vmem [shape: f32[32,16], index: 1, kind: input, shape index: {}]   ;;  %s335_s2 = inlined_call_operand.vmem [shape: f32[16,128], index: 2, kind: input, shape index: {}]   ;;  %s336_s3 = inlined_call_operand.vmem [shape: f32[1,128], index: 3, kind: input, shape index: {}]   ;;  %s337_s4 = inlined_call_operand.hbm [shape: f32[8,128], index: 4, kind: output, shape index: {}]  }
   0x1   :  { %v23_v0 = vld [vmem:[%s334_s1] sm:$0xff]  ;;  %v24_v1 = vld [vmem:[%s334_s1 + $0x8] sm:$0xff]  ;;  %v25_v2 = vld [vmem:[%s334_s1 + $0x10] sm:$0xff]  ;;  %231 = vmatprep.subr.bf16.mxu0 %v268_v3  ;;  %221 = vmatprep.mubr.msk.f32.mxu0 %vm269_vm0, %v270_v6 }
   0x2   :  { %v232_v4 = vpack.c.bf16 %v24_v1, %v23_v0  ;;  %v26_v5 = vld [vmem:[%s334_s1 + $0x18] sm:$0xff] }
   0x3   :  { %9 = vsyncpa [#allocation4], 0  ;;  %237 = vmatprep.subr.bf16.mxu1 %v268_v3  ;;  %228 = vmatprep.mubr.msk.f32.mxu1 %vm269_vm0, %v270_v6  ;;  %v235_v7 = vpack.c.bf16 %v26_v5, %v25_v2  ;;  %v22_v8 = vld [vmem:[%s333_s0] sm:$0xff]  ;;  %vm27_vm1 = vcmask 261120   ;;  %v105_v10 = vld [vmem:[%s335_s2 + $0x8] sm:$0xff]  ;;  %vm101_vm2 = vcmask 130048  }
   0x4   :  { %233 = vmatpush3.bf16.msra.mxu0 %v232_v4  ;;  %v104_v9 = vld [vmem:[%s335_s2] sm:$0xff]  ;;  %s271_s29 = smov [#allocation3]  }
   0x5   :  { %234 = vmatprep.subr.bf16.mxu0 %v268_v3  ;;  %v238_v11 = vpack.c.bf16 %v105_v10, %v104_v9  ;;  %v203_v15 = vld [vmem:[%s336_s3] ss:$0 sm:$0xff]  ;;  %s194_s30 = sshll.u32 %s271_s29, 4  ;;  %s195_s30 = int_to_ptr.vmem [resolvable:$true] %s194_s30 }
   0x6   :  { %s244_s2 = scalar_lea.vmem %s195_s30, 128  ;;  %p249_p1 = scmp.lt.s32.totalorder %s195_s30, %s195_s30 }
   0x7   :  { %239 = vmatpush3.bf16.msra.mxu1 %v238_v11  ;;  %p245_p0 = scmp.ne.s32.totalorder %s195_s30, %s244_s2  ;;  %p250_p2 = scmp.lt.s32.totalorder %s244_s2, %s244_s2 }
   0x8   :  { %236 = vmatpush3.bf16.msra.mxu0 %v235_v7 }
   0x9   :  { %p251_p3 = por %p250_p2, %p249_p1 }
   0xb   :  { %222 = vmatmul.mubr.msk.f32.vlgmr.msra.gmra.mrb[0].mxu0 %vm27_vm1, %v22_v8  ;;  %p252_p4 = pnand %p251_p3, %p245_p0 }
  0xde   :  { %v97_v12 = vpop.f32.mrb[0].mxu0 }
  0xdf   :  { %102 = vst.msk [vmem:[#allocation2] sm:$0xff] %vm101_vm2, %v97_v12  ;;  %v223_v13 = vpop.f32.mrb[1].mxu0 }
  0xe6   :  { %v103_v14 = vld [vmem:[#allocation2] sm:$0xff] }
  0xe7   :  { %229 = vmatmul.mubr.msk.f32.vlgmr.msra.gmra.mrb[0].mxu1 %vm101_vm2, %v103_v14 }
 0x1ba   :  { %v183_v16 = vpop.f32.mrb[0].mxu1 }
 0x1bb   :  { %v184_v17 = vadd.f32 %v203_v15, %v183_v16  ;;  %v230_v18 = vpop.f32.mrb[1].mxu1 }
 0x1bd   :  { %187 = vst [vmem:[#allocation3] sm:$0xff] %v184_v17 }
 0x1be   :  { %255 = shalt.err (!%p252_p4)
}
 0x1bf   :  { %s256_s7 = scalar_lea.hbm %s337_s4, 128 }
 0x1c0   :  { %p257_p5 = scmp.ne.s32.totalorder %s337_s4, %s256_s7  ;;  %p260_p6 = scmp.lt.u32.totalorder %s256_s7, %s337_s4 }
 0x1c2   :  { %p262_p7 = pnand %p260_p6, %p257_p5 }
 0x1c4   :  { %265 = shalt.err (!%p262_p7)
}
 0x1c5   :  { %197 = dma.vmem_to_hbm [thread:$0]  %s195_s30, 128, %s337_s4, [#allocation4]  }
 0x1c6   :  { %266 = dma.done.wait [#allocation4], 128  }
 0x1c7   :  { %267 = vsyncadd [#allocation4], 4294967168 }
 0x1c8   :  { %201 = vsyncpa [#allocation4], 1 }

</bundles_post_ra>
